<compile_context>
chip_gen: v5e
topology: v5e:2x2
jax: 0.10.0
libtpu: 0.0.40
codegen_flags: <defaults>
</compile_context>

<pallas_src>
import math
import jax
import jax.numpy as jnp
from jax.experimental import pallas as pl
from jax.experimental.pallas import tpu as pltpu


# ----------------------------------------------------------------------------
# Helpers
# ----------------------------------------------------------------------------

def _round_up(x, m):
    return ((x + m - 1) // m) * m


_SMALL_M = 128          # below this row count a plain-JAX dot beats kernel launch
_TM = 512               # fixed M tile for the Pallas matmul
_VMEM_LIMIT = 48 * 1024 * 1024   # fits v7x's 64 MiB physical VMEM with headroom


# ----------------------------------------------------------------------------
# Pallas kernels
# ----------------------------------------------------------------------------

def _mm_kernel(a_ref, b_ref, o_ref):
    o_ref[...] = jnp.dot(a_ref[...], b_ref[...],
                         preferred_element_type=jnp.float32)


def _mm_prelu_kernel(a_ref, b_ref, alpha_ref, o_ref):
    y = jnp.dot(a_ref[...], b_ref[...], preferred_element_type=jnp.float32)
    al = alpha_ref[0]                       # PReLU alpha (SMEM scalar)
    o_ref[...] = jnp.where(y >= 0.0, y, al * y)


def _gap_kernel(x_ref, o_ref):
    # column-chunk reduction with a lane-dense (R, 128) accumulator
    @pl.when(pl.program_id(0) == 0)
    def _():
        o_ref[...] = jnp.zeros_like(o_ref)
    xb = x_ref[...]
    acc = o_ref[...]
    for t in range(xb.shape[1] // 128):      # static unrolled lane-aligned adds
        acc = acc + xb[:, t * 128:(t + 1) * 128]
    o_ref[...] = acc


# ----------------------------------------------------------------------------
# Weight packing (done once at parameter-build time)
# ----------------------------------------------------------------------------

def _pack_matrix(wm, b=None):
    """wm: (K, N) float32 -> {f32 matrix, padded bf16 matrix for the MXU}."""
    wm = wm.astype(jnp.float32)
    K, N = wm.shape
    Kp = _round_up(max(K, 128), 128)
    Np = _round_up(max(N, 128), 128)
    wp = jnp.pad(wm, ((0, Kp - K), (0, Np - N))).astype(jnp.bfloat16)
    return {'wm': wm, 'wp': wp, 'k': K, 'n': N, 'b': b}


def pack_conv(w, b=None):
    cout, cin, kh, kw = w.shape
    p = _pack_matrix(w.reshape(cout, cin * kh * kw).T, b)
    p.update({'cout': cout, 'cin': cin, 'kh': kh, 'kw': kw, 'wraw': w})
    return p


def pack_convt(w):
    """ConvTranspose2d(C,C,3,stride=2,pad=1,out_pad=1) -> 4 phase matrices."""
    cin, cout, _, _ = w.shape
    Wab = lambda a, b: w[:, :, a, b]                       # (Cin, Cout)
    return {
        'ee': _pack_matrix(Wab(1, 1)),
        'eo': _pack_matrix(jnp.concatenate([Wab(1, 2), Wab(1, 0)], axis=0)),
        'oe': _pack_matrix(jnp.concatenate([Wab(2, 1), Wab(0, 1)], axis=0)),
        'oo': _pack_matrix(jnp.concatenate(
            [Wab(2, 2), Wab(2, 0), Wab(0, 2), Wab(0, 0)], axis=0)),
        'cin': cin, 'cout': cout,
    }


# ----------------------------------------------------------------------------
# Matmul dispatch (Pallas MXU for large M, plain JAX for tiny M)
# ----------------------------------------------------------------------------

def matmul_packed(a, pw, prelu_alpha=None):
    """a: (M, K) f32, pw: packed weight dict -> (M, N) f32 (+fused bias/PReLU)."""
    M, K = a.shape
    assert K == pw['k']
    N = pw['n']

    if M < _SMALL_M:
        # tiny matmul (e.g. channel attention on (B, C)): kernel launch overhead
        # dominates -> plain JAX on the VPU/MXU via XLA.
        y = jnp.dot(a.astype(jnp.float32), pw['wm'],
                    preferred_element_type=jnp.float32)
        if pw.get('b') is not None:
            y = y + pw['b'][None, :]
        if prelu_alpha is not None:
            y = jnp.where(y >= 0.0, y, prelu_alpha * y)
        return y

    Kp, Np = pw['wp'].shape
    Mp = _round_up(M, 16)
    if Mp <= _TM:
        tm = Mp
    else:
        tm = _TM
        Mp = _round_up(M, _TM)

    a_p = jnp.pad(a.astype(jnp.bfloat16), ((0, Mp - M), (0, Kp - K)))

    in_specs = [pl.BlockSpec((tm, Kp), lambda i: (i, 0)),
                pl.BlockSpec((Kp, Np), lambda i: (0, 0))]
    args = [a_p, pw['wp']]
    if prelu_alpha is None:
        kernel = _mm_kernel
    else:
        kernel = _mm_prelu_kernel
        in_specs.append(pl.BlockSpec(memory_space=pltpu.MemorySpace.SMEM))
        args.append(jnp.asarray(prelu_alpha, jnp.float32).reshape(1))

    out = pl.pallas_call(
        kernel,
        out_shape=jax.ShapeDtypeStruct((Mp, Np), jnp.float32),
        grid=(Mp // tm,),
        in_specs=in_specs,
        out_specs=pl.BlockSpec((tm, Np), lambda i: (i, 0)),
        compiler_params=pltpu.CompilerParams(
            dimension_semantics=("parallel",),
            vmem_limit_bytes=_VMEM_LIMIT),
    )(*args)

    y = out[:M, :N]
    if pw.get('b') is not None:
        y = y + pw['b'][None, :]
    return y


# ----------------------------------------------------------------------------
# Global average pooling (tiled Pallas reduction)
# ----------------------------------------------------------------------------

def global_avg_pool(x):
    """AdaptiveAvgPool2d(1): (N,C,H,W) -> (N,C,1,1)."""
    N, C, H, W = x.shape
    R = N * C
    HW = H * W
    Rp = _round_up(max(R, 8), 8)
    HWp = _round_up(max(HW, 128), 128)
    ck = min(HWp, 1024)
    Cp = _round_up(HWp, ck)
    xr = jnp.pad(x.reshape(R, HW).astype(jnp.float32),
                 ((0, Rp - R), (0, Cp - HW)))
    s = pl.pallas_call(
        _gap_kernel,
        out_shape=jax.ShapeDtypeStruct((Rp, 128), jnp.float32),
        grid=(Cp // ck,),
        in_specs=[pl.BlockSpec((Rp, ck), lambda j: (0, j))],
        out_specs=pl.BlockSpec((Rp, 128), lambda j: (0, 0)),
        compiler_params=pltpu.CompilerParams(
            dimension_semantics=("arbitrary",),
            vmem_limit_bytes=_VMEM_LIMIT),
    )(xr)
    return (jnp.sum(s[:R], axis=1) / float(HW)).reshape(N, C, 1, 1)


# ----------------------------------------------------------------------------
# Conv building blocks
# ----------------------------------------------------------------------------

def _im2col(xp, kh, kw):
    """stride-1 patch extraction; columns ordered (c, a, b) to match weights."""
    N, C, Hp, Wp = xp.shape
    Ho, Wo = Hp - kh + 1, Wp - kw + 1
    cols = [xp[:, :, a:a + Ho, b:b + Wo] for a in range(kh) for b in range(kw)]
    pat = jnp.stack(cols, axis=2)                    # (N, C, kh*kw, Ho, Wo)
    pat = pat.transpose(0, 3, 4, 1, 2).reshape(N * Ho * Wo, C * kh * kw)
    return pat, Ho, Wo


def conv2d(x, p, padding=0, pad_mode='zero', prelu_alpha=None):
    """nn.Conv2d equivalent with optional fused PReLU epilogue."""
    cout, cin, kh, kw = p['cout'], p['cin'], p['kh'], p['kw']
    N = x.shape[0]
    if padding > 0:
        mode = 'reflect' if pad_mode == 'reflect' else 'constant'
        xp = jnp.pad(x, ((0, 0), (0, 0), (padding, padding), (padding, padding)),
                     mode=mode)
    else:
        xp = x
    if kh == 1 and kw == 1:
        Ho, Wo = xp.shape[2], xp.shape[3]
        pat = xp.transpose(0, 2, 3, 1).reshape(N * Ho * Wo, cin)
    else:
        pat, Ho, Wo = _im2col(xp, kh, kw)
    y = matmul_packed(pat, p, prelu_alpha=prelu_alpha)
    return y.reshape(N, Ho, Wo, cout).transpose(0, 3, 1, 2)


def conv_transpose2d(x, p, prelu_alpha=None):
    """ConvTranspose2d(C,C,3,stride=2,padding=1,output_padding=1,bias=False)
    as a 4-phase decomposition (one matmul per output-pixel parity)."""
    N, C, H, W = x.shape
    cout = p['cout']
    xh = x.transpose(0, 2, 3, 1)                                   # NHWC
    x01 = jnp.pad(xh[:, :, 1:, :], ((0, 0), (0, 0), (0, 1), (0, 0)))   # x[m, j+1]
    x10 = jnp.pad(xh[:, 1:, :, :], ((0, 0), (0, 1), (0, 0), (0, 0)))   # x[m+1, j]
    x11 = jnp.pad(xh[:, 1:, 1:, :], ((0, 0), (0, 1), (0, 1), (0, 0)))  # x[m+1, j+1]
    M = N * H * W
    f = lambda t: t.reshape(M, C)
    yee = matmul_packed(f(xh), p['ee'], prelu_alpha)
    yeo = matmul_packed(jnp.concatenate([f(xh), f(x01)], axis=1), p['eo'],
                        prelu_alpha)
    yoe = matmul_packed(jnp.concatenate([f(xh), f(x10)], axis=1), p['oe'],
                        prelu_alpha)
    yoo = matmul_packed(jnp.concatenate([f(xh), f(x01), f(x10), f(x11)], axis=1),
                        p['oo'], prelu_alpha)
    r = lambda y: y.reshape(N, H, W, cout)
    out = jnp.zeros((N, 2 * H, 2 * W, cout), jnp.float32)
    out = out.at[:, 0::2, 0::2, :].set(r(yee))
    out = out.at[:, 0::2, 1::2, :].set(r(yeo))
    out = out.at[:, 1::2, 0::2, :].set(r(yoe))
    out = out.at[:, 1::2, 1::2, :].set(r(yoo))
    return out.transpose(0, 3, 1, 2)


# depthwise anti-alias blur (downsamp): outer([1,2,1],[1,2,1])/16, stride 2,
# reflect pad -- done as 9 shifted VPU multiply-adds (no MXU, no im2col).
_BLUR = [[1.0, 2.0, 1.0], [2.0, 4.0, 2.0], [1.0, 2.0, 1.0]]


def blur_downsample(x):
    N, C, H, W = x.shape
    xp = jnp.pad(x, ((0, 0), (0, 0), (1, 1), (1, 1)), mode='reflect')
    Ho = (H - 1) // 2 + 1
    Wo = (W - 1) // 2 + 1
    acc = None
    for a in range(3):
        for b in range(3):
            t = xp[:, :, a:a + 2 * (Ho - 1) + 1:2,
                   b:b + 2 * (Wo - 1) + 1:2] * (_BLUR[a][b] / 16.0)
            acc = t if acc is None else acc + t
    return acc


def sa_conv_direct(comp, w):
    """5x5 conv (2 -> 1 channels, zero pad 2) as 50 shifted VPU MACs."""
    N, _, H, W = comp.shape
    xp = jnp.pad(comp, ((0, 0), (0, 0), (2, 2), (2, 2)))
    out = jnp.zeros((N, 1, H, W), jnp.float32)
    for c in range(2):
        for a in range(5):
            for b in range(5):
                out = out + xp[:, c:c + 1, a:a + H, b:b + W] * w[0, c, a, b]
    return out


def bilinear_up2(x):
    """nn.Upsample(scale_factor=2, mode='bilinear', align_corners=False)."""
    N, C, H, W = x.shape

    def idx_w(in_size):
        o = jnp.arange(2 * in_size, dtype=jnp.float32)
        src = jnp.maximum((o + 0.5) / 2.0 - 0.5, 0.0)
        i0 = jnp.minimum(jnp.floor(src).astype(jnp.int32), in_size - 1)
        i1 = jnp.minimum(i0 + 1, in_size - 1)
        w1 = src - i0.astype(jnp.float32)
        return i0, i1, 1.0 - w1, w1

    hi0, hi1, hw0, hw1 = idx_w(H)
    wi0, wi1, ww0, ww1 = idx_w(W)
    xr = (x[:, :, hi0, :] * hw0[None, None, :, None]
          + x[:, :, hi1, :] * hw1[None, None, :, None])
    xc = (xr[:, :, :, wi0] * ww0[None, None, None, :]
          + xr[:, :, :, wi1] * ww1[None, None, None, :])
    return xc


def prelu(x, a):
    return jnp.where(x >= 0, x, a * x)


# ----------------------------------------------------------------------------
# Parameter construction (deterministic synthetic init, pre-packed weights)
# ----------------------------------------------------------------------------

class ParamInit:
    def __init__(self, key):
        self.key = key
        self.count = 0

    def _next(self):
        self.count += 1
        return jax.random.fold_in(self.key, self.count)

    def conv(self, cout, cin, kh, kw, bias=False):
        w = 0.05 * jax.random.normal(self._next(), (cout, cin, kh, kw), jnp.float32)
        b = (0.05 * jax.random.normal(self._next(), (cout,), jnp.float32)
             if bias else None)
        return pack_conv(w, b)

    def convt(self, cin, cout):
        w = 0.05 * jax.random.normal(self._next(), (cin, cout, 3, 3), jnp.float32)
        return pack_convt(w)

    def prelu(self):
        return jnp.float32(0.25)       # nn.PReLU() default


def make_dau(init, n_feat, reduction=8, bias=False):
    return {
        'body_conv1': init.conv(n_feat, n_feat, 3, 3, bias=bias),
        'act': init.prelu(),
        'body_conv2': init.conv(n_feat, n_feat, 3, 3, bias=bias),
        'sa_conv': init.conv(1, 2, 5, 5, bias=False),
        'ca_conv1': init.conv(n_feat // reduction, n_feat, 1, 1, bias=bias),
        'ca_conv2': init.conv(n_feat, n_feat // reduction, 1, 1, bias=bias),
        'conv1x1': init.conv(n_feat, 2 * n_feat, 1, 1, bias=bias),
    }


def make_rds(init, c):
    return {
        'top_conv1': init.conv(c, c, 1, 1),
        'top_prelu1': init.prelu(),
        'top_conv2': init.conv(c, c, 3, 3),
        'top_prelu2': init.prelu(),
        'top_conv3': init.conv(2 * c, c, 1, 1),
        'bot_conv': init.conv(2 * c, c, 1, 1),
    }


def make_rus(init, c):
    return {
        'top_conv1': init.conv(c, c, 1, 1),
        'top_prelu1': init.prelu(),
        'top_convt': init.convt(c, c),
        'top_prelu2': init.prelu(),
        'top_conv3': init.conv(c // 2, c, 1, 1),
        'bot_conv': init.conv(c // 2, c, 1, 1),
    }


def make_downsample(init, c, scale, stride=2):
    blocks = []
    for _ in range(int(math.log2(scale))):
        blocks.append(make_rds(init, c))
        c = int(c * stride)
    return blocks


def make_upsample(init, c, scale, stride=2):
    blocks = []
    for _ in range(int(math.log2(scale))):
        blocks.append(make_rus(init, c))
        c = int(c // stride)
    return blocks


def make_skff(init, c, height, reduction=8):
    d = max(int(c / reduction), 4)
    fcs = [init.conv(c, d, 1, 1) for _ in range(height)]
    return {
        'conv_du': init.conv(d, c, 1, 1),
        'conv_du_prelu': init.prelu(),
        'fcs': fcs,
        # fc weights stacked along N -> one small matmul instead of `height`
        'fcs_wm': jnp.concatenate([fc['wm'] for fc in fcs], axis=1),
    }


def make_msrb(init, n_feat, height, width, stride, bias):
    p = {}
    # NOTE: PyTorch builds `[DAU(...)] * width` -> the same DAU params are
    # reused for every column at a given height level.
    p['dau'] = [make_dau(init, int(n_feat * stride ** j), bias=bias)
                for j in range(height)]
    FEATS = [int(stride ** i * n_feat) for i in range(height)]
    SCALE = [2 ** i for i in range(1, height)]
    p['last_up'] = {str(i): make_upsample(init, int(n_feat * stride ** i), 2 ** i, stride)
                    for i in range(1, height)}
    SCALE_rev = list(reversed(SCALE))
    p['down'] = {}
    i = 0
    for feat in FEATS:
        for scale in SCALE_rev[i:]:
            p['down'][f'{feat}_{scale}'] = make_downsample(init, feat, scale, stride)
        i += 1
    p['up'] = {}
    i = 0
    for feat in reversed(FEATS):
        for scale in SCALE_rev[i:]:
            p['up'][f'{feat}_{scale}'] = make_upsample(init, feat, scale, stride)
        i += 1
    p['conv_out'] = init.conv(n_feat, n_feat, 3, 3, bias=bias)
    p['skff'] = [make_skff(init, int(n_feat * stride ** i), height)
                 for i in range(height)]
    return p


def make_mirnet(init, in_channels, out_channels, n_feat, kernel_size, stride,
                n_RRG, n_MSRB, height, width, bias):
    p = {'conv_in': init.conv(n_feat, in_channels, kernel_size, kernel_size, bias=bias)}
    p['rrgs'] = []
    for _ in range(n_RRG):
        p['rrgs'].append({
            'msrbs': [make_msrb(init, n_feat, height, width, stride, bias)
                      for _ in range(n_MSRB)],
            'conv': init.conv(n_feat, n_feat, 3, 3, bias=False),
        })
    p['conv_out'] = init.conv(out_channels, n_feat, kernel_size, kernel_size, bias=bias)
    return p


# ----------------------------------------------------------------------------
# Forward passes
# ----------------------------------------------------------------------------

def dau_forward(x, p):
    B, C = x.shape[0], x.shape[1]
    res = conv2d(x, p['body_conv1'], padding=1, prelu_alpha=p['act'])   # fused PReLU
    res = conv2d(res, p['body_conv2'], padding=1)
    # spatial attention: channel pool + direct 5x5 VPU conv (no MXU padding waste)
    comp = jnp.concatenate([jnp.max(res, axis=1, keepdims=True),
                            jnp.mean(res, axis=1, keepdims=True)], axis=1)
    sa = sa_conv_direct(comp, p['sa_conv']['wraw'])
    sa_branch = res * jax.nn.sigmoid(sa)
    # channel attention: tiny MLP on (B, C) -> plain JAX (M = batch)
    y = global_avg_pool(res).reshape(B, C)
    y = jax.nn.relu(matmul_packed(y, p['ca_conv1']))
    y = jax.nn.sigmoid(matmul_packed(y, p['ca_conv2']))
    ca_branch = res * y[:, :, None, None]
    cat = jnp.concatenate([sa_branch, ca_branch], axis=1)
    out = conv2d(cat, p['conv1x1'], padding=0)
    return out + x


def rds_forward(x, p):
    t = conv2d(x, p['top_conv1'], padding=0, prelu_alpha=p['top_prelu1'])
    t = conv2d(t, p['top_conv2'], padding=1, prelu_alpha=p['top_prelu2'])
    t = blur_downsample(t)
    t = conv2d(t, p['top_conv3'], padding=0)
    b = conv2d(blur_downsample(x), p['bot_conv'], padding=0)
    return t + b


def rus_forward(x, p):
    t = conv2d(x, p['top_conv1'], padding=0, prelu_alpha=p['top_prelu1'])
    t = conv_transpose2d(t, p['top_convt'], prelu_alpha=p['top_prelu2'])
    t = conv2d(t, p['top_conv3'], padding=0)
    b = conv2d(bilinear_up2(x), p['bot_conv'], padding=0)
    return t + b


def downsample_forward(x, blocks):
    for bp in blocks:
        x = rds_forward(x, bp)
    return x


def upsample_forward(x, blocks):
    for bp in blocks:
        x = rus_forward(x, bp)
    return x


def skff_forward(feats, p):
    inp = jnp.stack(feats, axis=1)                 # (B, height, C, H, W)
    U = jnp.sum(inp, axis=1)
    B, C = U.shape[0], U.shape[1]
    S = global_avg_pool(U).reshape(B, C)
    Z = matmul_packed(S, p['conv_du'], prelu_alpha=p['conv_du_prelu'])
    height = len(p['fcs'])
    att = jnp.dot(Z, p['fcs_wm'])                  # one stacked (B,d)@(d,h*C)
    att = jax.nn.softmax(att.reshape(B, height, C), axis=1)
    return jnp.sum(inp * att[:, :, :, None, None], axis=1)


def _select_up_down(tensor, j, k, p):
    if j == k:
        return tensor
    diff = 2 ** abs(j - k)
    c = tensor.shape[1]
    if j < k:
        return upsample_forward(tensor, p['up'][f'{c}_{diff}'])
    return downsample_forward(tensor, p['down'][f'{c}_{diff}'])


def msrb_forward(x, p, height, width):
    inp = x
    blocks_out = []
    for j in range(height):
        if j == 0:
            inp = dau_forward(inp, p['dau'][j])
        else:
            c = inp.shape[1]
            inp = dau_forward(downsample_forward(inp, p['down'][f'{c}_2']),
                              p['dau'][j])
        blocks_out.append(inp)
    for _ in range(1, width):
        tmp = []
        for j in range(height):
            TENSOR = [_select_up_down(blocks_out[k], j, k, p) for k in range(height)]
            tmp.append(skff_forward(TENSOR, p['skff'][j]))
        for j in range(height):
            blocks_out[j] = dau_forward(tmp[j], p['dau'][j])
    out = []
    for k in range(height):
        if k == 0:
            out.append(blocks_out[0])
        else:
            out.append(upsample_forward(blocks_out[k], p['last_up'][str(k)]))
    o = skff_forward(out, p['skff'][0])
    o = conv2d(o, p['conv_out'], padding=1)
    return o + x


def mirnet_forward(x, params, height, width):
    h = conv2d(x, params['conv_in'], padding=1)
    for rrg in params['rrgs']:
        res = h
        for mp in rrg['msrbs']:
            res = msrb_forward(res, mp, height, width)
        res = conv2d(res, rrg['conv'], padding=1)
        h = res + h
    out = conv2d(h, params['conv_out'], padding=1)
    return out + x


# ----------------------------------------------------------------------------

if __name__ == "__main__":
    # small but structurally faithful config
    cfg = dict(in_channels=3, out_channels=3, n_feat=8, kernel_size=3, stride=2,
               n_RRG=1, n_MSRB=1, height=3, width=2, bias=False)
    init = ParamInit(jax.random.PRNGKey(42))
    params = make_mirnet(init, **cfg)

    x = jax.random.normal(jax.random.PRNGKey(0), (2, 3, 16, 16), jnp.float32)
    y = mirnet_forward(x, params, cfg['height'], cfg['width'])
    jax.block_until_ready(y)
    assert y.shape == (2, 3, 16, 16) and y.dtype == jnp.float32
    assert bool(jnp.all(jnp.isfinite(y)))
    print("KERNEL_OK")
</pallas_src>

<mosaic_0001>
module attributes {stable_mosaic.version = 11 : i64} {
  func.func @_mm_kernel(%arg0: i32, %arg1: memref<512x128xbf16, #tpu.memory_space<vmem>>, %arg2: memref<128x128xbf16, #tpu.memory_space<vmem>>, %arg3: memref<512x128xf32, #tpu.memory_space<vmem>>) attributes {dimension_semantics = [#tpu.dimension_semantics<parallel>], iteration_bounds = array<i64: 1>, scalar_prefetch = 0 : i64, scratch_operands = 0 : i64, tpu.core_type = #tpu.core_type<tc>, window_params = [{transform_indices = @transform_0, window_bounds = array<i64: 512, 128>}, {pipeline_mode = #tpu.pipeline_mode<synchronous>, transform_indices = @transform_1, window_bounds = array<i64: 128, 128>}, {transform_indices = @transform_2, window_bounds = array<i64: 512, 128>}]} {
    %c0 = arith.constant 0 : index
    %c0_0 = arith.constant 0 : index
    %0 = vector.load %arg1[%c0, %c0_0] : memref<512x128xbf16, #tpu.memory_space<vmem>>, vector<512x128xbf16>
    %c0_1 = arith.constant 0 : index
    %c0_2 = arith.constant 0 : index
    %1 = vector.load %arg2[%c0_1, %c0_2] : memref<128x128xbf16, #tpu.memory_space<vmem>>, vector<128x128xbf16>
    %cst = arith.constant dense<0.000000e+00> : vector<512x128xf32>
    %2 = tpu.matmul %0, %1, %cst {dimension_numbers = #tpu.dot_dimension_numbers<[1], [0], [0], [1], [0, 0, 1, 1], [], []>} : vector<512x128xbf16>, vector<128x128xbf16>, vector<512x128xf32> -> vector<512x128xf32>
    %c0_3 = arith.constant 0 : index
    %c0_4 = arith.constant 0 : index
    %3 = vector.load %arg3[%c0_3, %c0_4] : memref<512x128xf32, #tpu.memory_space<vmem>>, vector<512x128xf32>
    tpu.vector_store %arg3[%c0_3, %c0_4], %2 {strides = array<i32>} : memref<512x128xf32, #tpu.memory_space<vmem>>, vector<512x128xf32>,
    return
  }
  func.func @transform_0(%arg0: i32) -> (i32, i32) {
    %c0_i32 = arith.constant 0 : i32
    %c0_i32_0 = arith.constant 0 : i32
    return %arg0, %c0_i32 : i32, i32
  }
  func.func @transform_1(%arg0: i32) -> (i32, i32) {
    %c0_i32 = arith.constant 0 : i32
    %c0_i32_0 = arith.constant 0 : i32
    %c0_i32_1 = arith.constant 0 : i32
    return %c0_i32, %c0_i32_0 : i32, i32
  }
  func.func @transform_2(%arg0: i32) -> (i32, i32) {
    %c0_i32 = arith.constant 0 : i32
    %c0_i32_0 = arith.constant 0 : i32
    return %arg0, %c0_i32 : i32, i32
  }
}

</mosaic_0001>

<bundles_post_ra>
// kernel: tpu_custom_call.1
= control target key start
LH: loop header
LB: loop body
LE: loop exit
PB: predicated region body
PF: predicated region fallthrough
CT: control target
= control target key end

     0   :  { %7 = vsyncpa [#allocation3], 0  ;;  %s957_s0 = inlined_call_operand.hbm [shape: bf16[512,128], index: 0, kind: input, shape index: {}]   ;;  %s958_s1 = inlined_call_operand.hbm [shape: bf16[128,128], index: 1, kind: input, shape index: {}]   ;;  %s959_s2 = inlined_call_operand.hbm [shape: f32[512,128], index: 2, kind: output, shape index: {}]  }
   0x1   :  { %8 = vsyncpa [#allocation6], 0 }
   0x2   :  { %9 = vsyncpa [#allocation4], 0  ;;  %s14_s11 = sshll.u32 %s957_s0, 4  ;;  %s926_s12 = smov [#allocation2]   ;;  %s15_s11 = int_to_ptr.hbm [resolvable:$true] %s14_s11 }
   0x3   :  { %s16_s13 = sshll.u32 %s926_s12, 4  ;;  %s27_s16 = sshll.u32 %s958_s1, 4  ;;  %s17_s13 = int_to_ptr.vmem [resolvable:$true] %s16_s13  ;;  %s28_s16 = int_to_ptr.hbm [resolvable:$true] %s27_s16 }
   0x4   :  { %s927_s17 = smov 64   ;;  %s928_s18 = smov 4  }
   0x5   :  { %22 = dma.hbm_to_vmem [thread:$0]  %s15_s11, 4096, %s17_s13, [#allocation3], %s927_s17, %s927_s17, %s928_s18  }
   0x6   :  { %s929_s19 = smov [#allocation5]  }
   0x7   :  { %s29_s20 = sshll.u32 %s929_s19, 4  ;;  %s30_s20 = int_to_ptr.vmem [resolvable:$true] %s29_s20 }
   0x8   :  { %35 = dma.hbm_to_vmem [thread:$0]  %s28_s16, 1024, %s30_s20, [#allocation6], %s927_s17, %s927_s17, %s928_s18  }
   0x9   :  { %920 = dma.done.wait [#allocation3], 4096  }
   0xa   :  { %921 = vsyncadd [#allocation3], 4294963200 }
   0xb   :  { %922 = dma.done.wait [#allocation6], 1024  }
   0xc   :  { %923 = vsyncadd [#allocation6], 4294966272  ;;  %v816_v0 = vld [vmem:[#allocation5 + $0x38] sm:$0xff]  ;;  %v815_v1 = vld [vmem:[#allocation5 + $0x30] sm:$0xff]  ;;  %s930_s0 = smov [#allocation7]   ;;  %s603_s23 = sshll.u32 %s959_s2, 4  ;;  %s604_s23 = int_to_ptr.hbm [resolvable:$true] %s603_s23 }
   0xd   :  { %364 = vmatpush.bf16.msra.mxu0 %v816_v0  ;;  %817 = vmatpush.bf16.msra.mxu1 %v816_v0  ;;  %v814_v2 = vld [vmem:[#allocation5 + $0x28] sm:$0xff]  ;;  %v813_v3 = vld [vmem:[#allocation5 + $0x20] sm:$0xff]  ;;  %v812_v4 = vld [vmem:[#allocation5 + $0x18] sm:$0xff]  ;;  %s601_s1 = sshll.u32 %s930_s0, 4  ;;  %s931_s24 = smov 128   ;;  %s602_s1 = int_to_ptr.vmem [resolvable:$true] %s601_s1 }
   0xe   :  { %818 = vmatpush.bf16.msra.mxu2 %v816_v0  ;;  %819 = vmatpush.bf16.msra.mxu3 %v816_v0  ;;  %v811_v5 = vld [vmem:[#allocation5 + $0x10] sm:$0xff]  ;;  %v810_v6 = vld [vmem:[#allocation5 + $0x8] sm:$0xff]  ;;  %v809_v7 = vld [vmem:[#allocation5] sm:$0xff]  ;;  %s932_s25 = smov 8  }
   0xf   :  { %v777_v8 = vld [vmem:[#allocation2] sm:$0xff]  ;;  %v778_v12 = vld [vmem:[#allocation2 + $0x8] sm:$0xff]  ;;  %v779_v16 = vld [vmem:[#allocation2 + $0x10] sm:$0xff] }
  0x10   :  { %v785_v9 = vld [vmem:[#allocation2 + $0x40] sm:$0xff]  ;;  %v786_v13 = vld [vmem:[#allocation2 + $0x48] sm:$0xff]  ;;  %v787_v17 = vld [vmem:[#allocation2 + $0x50] sm:$0xff] }
  0x11   :  { %365 = vmatpush.bf16.msra.mxu0 %v815_v1  ;;  %820 = vmatpush.bf16.msra.mxu1 %v815_v1  ;;  %v793_v10 = vld [vmem:[#allocation2 + $0x80] sm:$0xff]  ;;  %v794_v14 = vld [vmem:[#allocation2 + $0x88] sm:$0xff]  ;;  %v795_v18 = vld [vmem:[#allocation2 + $0x90] sm:$0xff] }
  0x12   :  { %821 = vmatpush.bf16.msra.mxu2 %v815_v1  ;;  %822 = vmatpush.bf16.msra.mxu3 %v815_v1  ;;  %v801_v11 = vld [vmem:[#allocation2 + $0xc0] sm:$0xff]  ;;  %v802_v15 = vld [vmem:[#allocation2 + $0xc8] sm:$0xff]  ;;  %v803_v19 = vld [vmem:[#allocation2 + $0xd0] sm:$0xff] }
  0x13   :  { %v780_v20 = vld [vmem:[#allocation2 + $0x18] sm:$0xff]  ;;  %v781_v24 = vld [vmem:[#allocation2 + $0x20] sm:$0xff]  ;;  %v782_v28 = vld [vmem:[#allocation2 + $0x28] sm:$0xff] }
  0x14   :  { %v788_v21 = vld [vmem:[#allocation2 + $0x58] sm:$0xff]  ;;  %v789_v25 = vld [vmem:[#allocation2 + $0x60] sm:$0xff]  ;;  %v790_v29 = vld [vmem:[#allocation2 + $0x68] sm:$0xff] }
  0x15   :  { %366 = vmatpush.bf16.msra.mxu0 %v814_v2  ;;  %823 = vmatpush.bf16.msra.mxu1 %v814_v2  ;;  %v796_v22 = vld [vmem:[#allocation2 + $0x98] sm:$0xff]  ;;  %v797_v26 = vld [vmem:[#allocation2 + $0xa0] sm:$0xff]  ;;  %v798_v30 = vld [vmem:[#allocation2 + $0xa8] sm:$0xff] }
  0x16   :  { %824 = vmatpush.bf16.msra.mxu2 %v814_v2  ;;  %825 = vmatpush.bf16.msra.mxu3 %v814_v2  ;;  %v804_v23 = vld [vmem:[#allocation2 + $0xd8] sm:$0xff]  ;;  %v805_v27 = vld [vmem:[#allocation2 + $0xe0] sm:$0xff]  ;;  %v806_v31 = vld [vmem:[#allocation2 + $0xe8] sm:$0xff] }
  0x17   :  { %v783_v32 = vld [vmem:[#allocation2 + $0x30] sm:$0xff]  ;;  %v784_v36 = vld [vmem:[#allocation2 + $0x38] sm:$0xff] }
  0x18   :  { %v791_v33 = vld [vmem:[#allocation2 + $0x70] sm:$0xff]  ;;  %v792_v37 = vld [vmem:[#allocation2 + $0x78] sm:$0xff] }
  0x19   :  { %367 = vmatpush.bf16.msra.mxu0 %v813_v3  ;;  %826 = vmatpush.bf16.msra.mxu1 %v813_v3  ;;  %v799_v34 = vld [vmem:[#allocation2 + $0xb0] sm:$0xff]  ;;  %v800_v38 = vld [vmem:[#allocation2 + $0xb8] sm:$0xff] }
  0x1a   :  { %827 = vmatpush.bf16.msra.mxu2 %v813_v3  ;;  %828 = vmatpush.bf16.msra.mxu3 %v813_v3  ;;  %v807_v35 = vld [vmem:[#allocation2 + $0xf0] sm:$0xff]  ;;  %v808_v39 = vld [vmem:[#allocation2 + $0xf8] sm:$0xff] }
  0x1d   :  { %368 = vmatpush.bf16.msra.mxu0 %v812_v4  ;;  %829 = vmatpush.bf16.msra.mxu1 %v812_v4 }
  0x1e   :  { %830 = vmatpush.bf16.msra.mxu2 %v812_v4  ;;  %831 = vmatpush.bf16.msra.mxu3 %v812_v4 }
  0x21   :  { %369 = vmatpush.bf16.msra.mxu0 %v811_v5  ;;  %832 = vmatpush.bf16.msra.mxu1 %v811_v5 }
  0x22   :  { %833 = vmatpush.bf16.msra.mxu2 %v811_v5  ;;  %834 = vmatpush.bf16.msra.mxu3 %v811_v5 }
  0x25   :  { %370 = vmatpush.bf16.msra.mxu0 %v810_v6  ;;  %835 = vmatpush.bf16.msra.mxu1 %v810_v6 }
  0x26   :  { %836 = vmatpush.bf16.msra.mxu2 %v810_v6  ;;  %837 = vmatpush.bf16.msra.mxu3 %v810_v6 }
  0x29   :  { %371 = vmatpush.bf16.msra.mxu0 %v809_v7  ;;  %838 = vmatpush.bf16.msra.mxu1 %v809_v7 }
  0x2a   :  { %839 = vmatpush.bf16.msra.mxu2 %v809_v7  ;;  %840 = vmatpush.bf16.msra.mxu3 %v809_v7 }
  0x2c   :  { %372 = vmatmul.bf16.vlgmr.msra.gmra.mxu0 %v777_v8  ;;  %412 = vmatmul.bf16.vlgmr.msra.gmra.mxu1 %v785_v9 }
  0x2d   :  { %452 = vmatmul.bf16.vlgmr.msra.gmra.mxu2 %v793_v10  ;;  %492 = vmatmul.bf16.vlgmr.msra.gmra.mxu3 %v801_v11 }
  0x3c   :  { %377 = vmatmul.bf16.gmra.mxu0 %v778_v12  ;;  %417 = vmatmul.bf16.gmra.mxu1 %v786_v13 }
  0x3d   :  { %457 = vmatmul.bf16.gmra.mxu2 %v794_v14  ;;  %497 = vmatmul.bf16.gmra.mxu3 %v802_v15 }
  0x4c   :  { %382 = vmatmul.bf16.gmra.mxu0 %v779_v16  ;;  %422 = vmatmul.bf16.gmra.mxu1 %v787_v17 }
  0x4d   :  { %462 = vmatmul.bf16.gmra.mxu2 %v795_v18  ;;  %502 = vmatmul.bf16.gmra.mxu3 %v803_v19 }
  0x5c   :  { %387 = vmatmul.bf16.gmra.mxu0 %v780_v20  ;;  %427 = vmatmul.bf16.gmra.mxu1 %v788_v21 }
  0x5d   :  { %467 = vmatmul.bf16.gmra.mxu2 %v796_v22  ;;  %507 = vmatmul.bf16.gmra.mxu3 %v804_v23 }
  0x6c   :  { %392 = vmatmul.bf16.gmra.mxu0 %v781_v24  ;;  %432 = vmatmul.bf16.gmra.mxu1 %v789_v25 }
  0x6d   :  { %472 = vmatmul.bf16.gmra.mxu2 %v797_v26  ;;  %512 = vmatmul.bf16.gmra.mxu3 %v805_v27 }
  0x7c   :  { %397 = vmatmul.bf16.gmra.mxu0 %v782_v28  ;;  %437 = vmatmul.bf16.gmra.mxu1 %v790_v29 }
  0x7d   :  { %477 = vmatmul.bf16.gmra.mxu2 %v798_v30  ;;  %517 = vmatmul.bf16.gmra.mxu3 %v806_v31 }
  0x8c   :  { %402 = vmatmul.bf16.gmra.mxu0 %v783_v32  ;;  %442 = vmatmul.bf16.gmra.mxu1 %v791_v33 }
  0x8d   :  { %482 = vmatmul.bf16.gmra.mxu2 %v799_v34  ;;  %522 = vmatmul.bf16.gmra.mxu3 %v807_v35 }
  0x9c   :  { %407 = vmatmul.bf16.gmra.mxu0 %v784_v36  ;;  %447 = vmatmul.bf16.gmra.mxu1 %v792_v37 }
  0x9d   :  { %487 = vmatmul.bf16.gmra.mxu2 %v800_v38  ;;  %527 = vmatmul.bf16.gmra.mxu3 %v808_v39 }
  0xa9   :  { %v373_v40 = vpop.f32.mrf.mxu0  ;;  %v413_v41 = vpop.f32.mrf.mxu1 }
  0xaa   :  { %533 = vst [vmem:[#allocation7] sm:$0xff] %v373_v40 }
  0xab   :  { %549 = vst [vmem:[#allocation7 + $0x80] sm:$0xff] %v413_v41 }
  0xb0   :  { %v453_v42 = vpop.f32.mrf.mxu2  ;;  %v493_v43 = vpop.f32.mrf.mxu3 }
  0xb1   :  { %565 = vst [vmem:[#allocation7 + $0x100] sm:$0xff] %v453_v42  ;;  %v375_v44 = vpop.f32.mrf.mxu0  ;;  %v415_v45 = vpop.f32.mrf.mxu1 }
  0xb2   :  { %581 = vst [vmem:[#allocation7 + $0x180] sm:$0xff] %v493_v43 }
  0xb3   :  { %534 = vst [vmem:[#allocation7 + $0x8] sm:$0xff] %v375_v44 }
  0xb4   :  { %550 = vst [vmem:[#allocation7 + $0x88] sm:$0xff] %v415_v45 }
  0xb8   :  { %v455_v46 = vpop.f32.mrf.mxu2  ;;  %v495_v47 = vpop.f32.mrf.mxu3 }
  0xb9   :  { %566 = vst [vmem:[#allocation7 + $0x108] sm:$0xff] %v455_v46  ;;  %v378_v48 = vpop.f32.mrf.mxu0  ;;  %v418_v49 = vpop.f32.mrf.mxu1 }
  0xba   :  { %582 = vst [vmem:[#allocation7 + $0x188] sm:$0xff] %v495_v47 }
  0xbb   :  { %535 = vst [vmem:[#allocation7 + $0x10] sm:$0xff] %v378_v48 }
  0xbc   :  { %551 = vst [vmem:[#allocation7 + $0x90] sm:$0xff] %v418_v49 }
  0xc0   :  { %v458_v50 = vpop.f32.mrf.mxu2  ;;  %v498_v51 = vpop.f32.mrf.mxu3 }
  0xc1   :  { %567 = vst [vmem:[#allocation7 + $0x110] sm:$0xff] %v458_v50  ;;  %v380_v52 = vpop.f32.mrf.mxu0  ;;  %v420_v53 = vpop.f32.mrf.mxu1 }
  0xc2   :  { %583 = vst [vmem:[#allocation7 + $0x190] sm:$0xff] %v498_v51 }
  0xc3   :  { %536 = vst [vmem:[#allocation7 + $0x18] sm:$0xff] %v380_v52 }
  0xc4   :  { %552 = vst [vmem:[#allocation7 + $0x98] sm:$0xff] %v420_v53 }
  0xc8   :  { %v460_v54 = vpop.f32.mrf.mxu2  ;;  %v500_v55 = vpop.f32.mrf.mxu3 }
  0xc9   :  { %568 = vst [vmem:[#allocation7 + $0x118] sm:$0xff] %v460_v54  ;;  %v383_v56 = vpop.f32.mrf.mxu0  ;;  %v423_v57 = vpop.f32.mrf.mxu1 }
  0xca   :  { %584 = vst [vmem:[#allocation7 + $0x198] sm:$0xff] %v500_v55 }
  0xcb   :  { %537 = vst [vmem:[#allocation7 + $0x20] sm:$0xff] %v383_v56 }
  0xcc   :  { %553 = vst [vmem:[#allocation7 + $0xa0] sm:$0xff] %v423_v57 }
  0xd0   :  { %v463_v58 = vpop.f32.mrf.mxu2  ;;  %v503_v59 = vpop.f32.mrf.mxu3 }
  0xd1   :  { %569 = vst [vmem:[#allocation7 + $0x120] sm:$0xff] %v463_v58  ;;  %v385_v60 = vpop.f32.mrf.mxu0  ;;  %v425_v61 = vpop.f32.mrf.mxu1 }
  0xd2   :  { %585 = vst [vmem:[#allocation7 + $0x1a0] sm:$0xff] %v503_v59 }
  0xd3   :  { %538 = vst [vmem:[#allocation7 + $0x28] sm:$0xff] %v385_v60 }
  0xd4   :  { %554 = vst [vmem:[#allocation7 + $0xa8] sm:$0xff] %v425_v61 }
  0xd8   :  { %v465_v62 = vpop.f32.mrf.mxu2  ;;  %v505_v63 = vpop.f32.mrf.mxu3 }
  0xd9   :  { %570 = vst [vmem:[#allocation7 + $0x128] sm:$0xff] %v465_v62  ;;  %v388_v0 = vpop.f32.mrf.mxu0  ;;  %v428_v1 = vpop.f32.mrf.mxu1 }
  0xda   :  { %586 = vst [vmem:[#allocation7 + $0x1a8] sm:$0xff] %v505_v63 }
  0xdb   :  { %539 = vst [vmem:[#allocation7 + $0x30] sm:$0xff] %v388_v0 }
  0xdc   :  { %555 = vst [vmem:[#allocation7 + $0xb0] sm:$0xff] %v428_v1 }
  0xe0   :  { %v468_v2 = vpop.f32.mrf.mxu2  ;;  %v508_v3 = vpop.f32.mrf.mxu3 }
  0xe1   :  { %571 = vst [vmem:[#allocation7 + $0x130] sm:$0xff] %v468_v2  ;;  %v390_v4 = vpop.f32.mrf.mxu0  ;;  %v430_v5 = vpop.f32.mrf.mxu1 }
  0xe2   :  { %587 = vst [vmem:[#allocation7 + $0x1b0] sm:$0xff] %v508_v3 }
  0xe3   :  { %540 = vst [vmem:[#allocation7 + $0x38] sm:$0xff] %v390_v4 }
  0xe4   :  { %556 = vst [vmem:[#allocation7 + $0xb8] sm:$0xff] %v430_v5 }
  0xe8   :  { %v470_v6 = vpop.f32.mrf.mxu2  ;;  %v510_v7 = vpop.f32.mrf.mxu3 }
  0xe9   :  { %572 = vst [vmem:[#allocation7 + $0x138] sm:$0xff] %v470_v6  ;;  %v393_v8 = vpop.f32.mrf.mxu0  ;;  %v433_v9 = vpop.f32.mrf.mxu1 }
  0xea   :  { %588 = vst [vmem:[#allocation7 + $0x1b8] sm:$0xff] %v510_v7 }
  0xeb   :  { %541 = vst [vmem:[#allocation7 + $0x40] sm:$0xff] %v393_v8 }
  0xec   :  { %557 = vst [vmem:[#allocation7 + $0xc0] sm:$0xff] %v433_v9 }
  0xf0   :  { %v473_v10 = vpop.f32.mrf.mxu2  ;;  %v513_v11 = vpop.f32.mrf.mxu3 }
  0xf1   :  { %573 = vst [vmem:[#allocation7 + $0x140] sm:$0xff] %v473_v10  ;;  %v395_v12 = vpop.f32.mrf.mxu0  ;;  %v435_v13 = vpop.f32.mrf.mxu1 }
  0xf2   :  { %589 = vst [vmem:[#allocation7 + $0x1c0] sm:$0xff] %v513_v11 }
  0xf3   :  { %542 = vst [vmem:[#allocation7 + $0x48] sm:$0xff] %v395_v12 }
  0xf4   :  { %558 = vst [vmem:[#allocation7 + $0xc8] sm:$0xff] %v435_v13 }
  0xf8   :  { %v475_v14 = vpop.f32.mrf.mxu2  ;;  %v515_v15 = vpop.f32.mrf.mxu3 }
  0xf9   :  { %574 = vst [vmem:[#allocation7 + $0x148] sm:$0xff] %v475_v14  ;;  %v398_v16 = vpop.f32.mrf.mxu0  ;;  %v438_v17 = vpop.f32.mrf.mxu1 }
  0xfa   :  { %590 = vst [vmem:[#allocation7 + $0x1c8] sm:$0xff] %v515_v15 }
  0xfb   :  { %543 = vst [vmem:[#allocation7 + $0x50] sm:$0xff] %v398_v16 }
  0xfc   :  { %559 = vst [vmem:[#allocation7 + $0xd0] sm:$0xff] %v438_v17 }
 0x100   :  { %v478_v18 = vpop.f32.mrf.mxu2  ;;  %v518_v19 = vpop.f32.mrf.mxu3 }
 0x101   :  { %575 = vst [vmem:[#allocation7 + $0x150] sm:$0xff] %v478_v18  ;;  %v400_v20 = vpop.f32.mrf.mxu0  ;;  %v440_v21 = vpop.f32.mrf.mxu1 }
 0x102   :  { %591 = vst [vmem:[#allocation7 + $0x1d0] sm:$0xff] %v518_v19 }
 0x103   :  { %544 = vst [vmem:[#allocation7 + $0x58] sm:$0xff] %v400_v20 }
 0x104   :  { %560 = vst [vmem:[#allocation7 + $0xd8] sm:$0xff] %v440_v21 }
 0x108   :  { %v480_v22 = vpop.f32.mrf.mxu2  ;;  %v520_v23 = vpop.f32.mrf.mxu3 }
 0x109   :  { %576 = vst [vmem:[#allocation7 + $0x158] sm:$0xff] %v480_v22  ;;  %v403_v24 = vpop.f32.mrf.mxu0  ;;  %v443_v25 = vpop.f32.mrf.mxu1 }
 0x10a   :  { %592 = vst [vmem:[#allocation7 + $0x1d8] sm:$0xff] %v520_v23 }
 0x10b   :  { %545 = vst [vmem:[#allocation7 + $0x60] sm:$0xff] %v403_v24 }
 0x10c   :  { %561 = vst [vmem:[#allocation7 + $0xe0] sm:$0xff] %v443_v25 }
 0x110   :  { %v483_v26 = vpop.f32.mrf.mxu2  ;;  %v523_v27 = vpop.f32.mrf.mxu3 }
 0x111   :  { %577 = vst [vmem:[#allocation7 + $0x160] sm:$0xff] %v483_v26  ;;  %v405_v28 = vpop.f32.mrf.mxu0  ;;  %v445_v29 = vpop.f32.mrf.mxu1 }
 0x112   :  { %593 = vst [vmem:[#allocation7 + $0x1e0] sm:$0xff] %v523_v27 }
 0x113   :  { %546 = vst [vmem:[#allocation7 + $0x68] sm:$0xff] %v405_v28 }
 0x114   :  { %562 = vst [vmem:[#allocation7 + $0xe8] sm:$0xff] %v445_v29 }
 0x118   :  { %v485_v30 = vpop.f32.mrf.mxu2  ;;  %v525_v31 = vpop.f32.mrf.mxu3 }
 0x119   :  { %578 = vst [vmem:[#allocation7 + $0x168] sm:$0xff] %v485_v30  ;;  %v408_v32 = vpop.f32.mrf.mxu0  ;;  %v448_v33 = vpop.f32.mrf.mxu1 }
 0x11a   :  { %594 = vst [vmem:[#allocation7 + $0x1e8] sm:$0xff] %v525_v31 }
 0x11b   :  { %547 = vst [vmem:[#allocation7 + $0x70] sm:$0xff] %v408_v32 }
 0x11c   :  { %563 = vst [vmem:[#allocation7 + $0xf0] sm:$0xff] %v448_v33 }
 0x120   :  { %v488_v34 = vpop.f32.mrf.mxu2  ;;  %v528_v35 = vpop.f32.mrf.mxu3 }
 0x121   :  { %579 = vst [vmem:[#allocation7 + $0x170] sm:$0xff] %v488_v34  ;;  %v410_v36 = vpop.f32.mrf.mxu0  ;;  %v450_v37 = vpop.f32.mrf.mxu1 }
 0x122   :  { %595 = vst [vmem:[#allocation7 + $0x1f0] sm:$0xff] %v528_v35 }
 0x123   :  { %548 = vst [vmem:[#allocation7 + $0x78] sm:$0xff] %v410_v36 }
 0x124   :  { %564 = vst [vmem:[#allocation7 + $0xf8] sm:$0xff] %v450_v37 }
 0x128   :  { %v490_v38 = vpop.f32.mrf.mxu2  ;;  %v530_v39 = vpop.f32.mrf.mxu3 }
 0x129   :  { %580 = vst [vmem:[#allocation7 + $0x178] sm:$0xff] %v490_v38 }
 0x12a   :  { %596 = vst [vmem:[#allocation7 + $0x1f8] sm:$0xff] %v530_v39 }
 0x12b   :  { %609 = dma.vmem_to_hbm [thread:$0]  %s602_s1, 8192, %s604_s23, [#allocation4], %s931_s24, %s931_s24, %s932_s25  }
 0x12c   :  { %924 = dma.done.wait [#allocation4], 8192  }
 0x12d   :  { %925 = vsyncadd [#allocation4], 4294959104 }
 0x12e   :  { %614 = vsyncpa [#allocation3], 1 }
 0x12f   :  { %615 = vsyncpa [#allocation6], 1 }
 0x130   :  { %616 = vsyncpa [#allocation4], 1 }

</bundles_post_ra>
